<compile_context>
chip_gen: v6e
topology: v6e:2x2x1
jax: 0.10.0
libtpu: 0.0.40
codegen_flags: <defaults>
</compile_context>

<pallas_src>
import functools

import jax
import jax.numpy as jnp
from jax.experimental import pallas as pl
from jax.experimental.pallas import tpu as pltpu

_EPS = 1e-12          # F.normalize default eps
_EPS2 = _EPS * _EPS


def _round_up(x, m):
    return ((x + m - 1) // m) * m


def _normalize_rows_f32(x):
    """F.normalize(x, dim=-1, p=2): x / max(||x||, eps), via rsqrt (EUP)."""
    sumsq = jnp.sum(x * x, axis=-1, keepdims=True)
    return x * jax.lax.rsqrt(jnp.maximum(sumsq, _EPS2))


def _g2l_accum_kernel(*refs, num_graphs, has_batch, tile_n, tiles_inner,
                      num_nodes, need_row_mask):
    """Per node-tile: acc += pos_mask_tile @ normalize(h_tile) for both streams.

    acc blocks are resident across the inner ("arbitrary") grid axis; the outer
    ("parallel") axis gives each TensorCore its own partial accumulators.
    """
    if has_batch:
        batch_ref, h1_ref, h2_ref, acc1_ref, acc2_ref = refs
    else:
        h1_ref, h2_ref, acc1_ref, acc2_ref = refs
        batch_ref = None

    s = pl.program_id(0)   # core slice (parallel)
    i = pl.program_id(1)   # node-tile within the slice (reduction)

    @pl.when(i == 0)
    def _init():
        acc1_ref[...] = jnp.zeros_like(acc1_ref)
        acc2_ref[...] = jnp.zeros_like(acc2_ref)

    h1 = h1_ref[...].astype(jnp.float32)
    h2 = h2_ref[...].astype(jnp.float32)

    if need_row_mask:
        # Ragged last tile / phantom slot: zero out rows past the real node
        # count so stale VMEM / duplicated data contributes exactly nothing
        # (jnp.where also blocks any NaN garbage from propagating).
        node0 = (s * tiles_inner + i) * tile_n
        row_idx = jax.lax.broadcasted_iota(jnp.int32, (tile_n, 1), 0) + node0
        valid_col = row_idx < num_nodes
        h1 = jnp.where(valid_col, h1, 0.0)
        h2 = jnp.where(valid_col, h2, 0.0)

    # Per-node inverse L2 norm on the EUP (1/max(||h||, eps)).
    inv1 = jax.lax.rsqrt(
        jnp.maximum(jnp.sum(h1 * h1, axis=-1, keepdims=True), _EPS2))
    inv2 = jax.lax.rsqrt(
        jnp.maximum(jnp.sum(h2 * h2, axis=-1, keepdims=True), _EPS2))

    if has_batch:
        # pos_mask tile built in-registers: mask[g, n] = (batch[n] == g).
        graph_ids = jax.lax.broadcasted_iota(jnp.int32, (num_graphs, tile_n), 0)
        mask = batch_ref[...] == graph_ids
        if need_row_mask:
            node0 = (s * tiles_inner + i) * tile_n
            lane_idx = jax.lax.broadcasted_iota(
                jnp.int32, (1, tile_n), 1) + node0
            mask = jnp.logical_and(mask, lane_idx < num_nodes)
        mask = mask.astype(jnp.bfloat16)
        # bf16 MXU operands, f32 accumulation.  (For very large graphs, keep
        # these in f32 with Precision.HIGHEST if tighter accuracy is needed.)
        h1b = (h1 * inv1).astype(jnp.bfloat16)
        h2b = (h2 * inv2).astype(jnp.bfloat16)
        dn = (((1,), (0,)), ((), ()))  # (G, TN) @ (TN, D) -> (G, D)
        acc1_ref[...] += jax.lax.dot_general(
            mask, h1b, dn, preferred_element_type=jnp.float32)
        acc2_ref[...] += jax.lax.dot_general(
            mask, h2b, dn, preferred_element_type=jnp.float32)
    else:
        # batch=None: all-ones pos_mask == plain column sum; stay in f32 (VPU).
        acc1_ref[...] += jnp.sum(h1 * inv1, axis=0, keepdims=True)
        acc2_ref[...] += jnp.sum(h2 * inv2, axis=0, keepdims=True)


def _vmem_plan():
    """(streamed-data budget, explicit vmem limit) in bytes, per generation."""
    cap = None
    try:
        cap = int(pltpu.get_tpu_info().vmem_capacity_bytes)
    except Exception:
        cap = None
    if cap is not None and cap >= 100 * 1024 * 1024:
        data_budget = 48 * 1024 * 1024    # v5e / v6e: 128 MiB physical VMEM
    else:
        data_budget = 28 * 1024 * 1024    # v7x (64 MiB physical) or unknown
    vmem_limit = data_budget + 20 * 1024 * 1024
    return data_budget, vmem_limit


def _choose_tile_n(num_nodes, d, g_acc, itemsize, data_budget):
    """Largest 128-multiple node tile whose real VMEM footprint fits budget."""
    d_layout = _round_up(max(d, 1), 128)          # minor-dim layout padding
    # Per node-row: 2 streams x (double-buffered input block + ~2 live f32
    # temporaries + bf16 MXU operand) + per-node column of the (G, TN) mask.
    per_row = 2 * d_layout * (2 * itemsize + 4 + 4 + 2) + g_acc * 8
    fixed = 2 * 2 * g_acc * d_layout * 4          # resident f32 accumulators
    avail = max(data_budget - fixed, 1 << 20)
    tn = (avail // per_row // 128) * 128
    tn = int(max(128, min(tn, 8192)))
    tn = min(tn, _round_up(max(num_nodes, 1), 128))
    return int(tn)


def _run_accum(h1, h2, batch2d, g_acc, has_batch, tile_n=None):
    n, d = h1.shape
    itemsize = jnp.dtype(h1.dtype).itemsize
    data_budget, vmem_limit = _vmem_plan()
    if tile_n is None:
        tile_n = _choose_tile_n(n, d, g_acc, itemsize, data_budget)
    assert tile_n % 128 == 0

    n_tiles = pl.cdiv(n, tile_n)
    s_slices = 2 if n_tiles >= 2 else 1           # v7x: one slice per TensorCore
    tiles_inner = pl.cdiv(n_tiles, s_slices)
    has_phantom = s_slices * tiles_inner > n_tiles
    need_row_mask = (n % tile_n != 0) or has_phantom
    last_tile = n_tiles - 1

    def tile_idx(s, i):
        # Clamp so a phantom slot's DMA re-reads the last real tile (finite
        # data); its contribution is zeroed in-kernel by the row mask.
        return jnp.minimum(s * tiles_inner + i, last_tile)

    h_spec = pl.BlockSpec((tile_n, d), lambda s, i: (tile_idx(s, i), 0))
    acc_spec = pl.BlockSpec((None, g_acc, d), lambda s, i: (s, 0, 0))

    in_specs = [h_spec, h_spec]
    args = [h1, h2]
    if has_batch:
        in_specs = [pl.BlockSpec((1, tile_n),
                                 lambda s, i: (0, tile_idx(s, i)))] + in_specs
        args = [batch2d] + args

    kernel = functools.partial(
        _g2l_accum_kernel, num_graphs=g_acc, has_batch=has_batch,
        tile_n=tile_n, tiles_inner=tiles_inner, num_nodes=n,
        need_row_mask=need_row_mask)

    acc1, acc2 = pl.pallas_call(
        kernel,
        out_shape=(
            jax.ShapeDtypeStruct((s_slices, g_acc, d), jnp.float32),
            jax.ShapeDtypeStruct((s_slices, g_acc, d), jnp.float32),
        ),
        grid_spec=pltpu.PrefetchScalarGridSpec(
            num_scalar_prefetch=0,
            grid=(s_slices, tiles_inner),
            in_specs=in_specs,
            out_specs=[acc_spec, acc_spec],
        ),
        compiler_params=pltpu.CompilerParams(
            dimension_semantics=("parallel", "arbitrary"),
            vmem_limit_bytes=vmem_limit),
    )(*args)
    return acc1, acc2


def _finalize(g1, g2, acc1, acc2):
    """O(G*D) glue: sum per-core partials, normalize g, dot, mean."""
    acc1 = jnp.sum(acc1, axis=0)
    acc2 = jnp.sum(acc2, axis=0)
    g1n = _normalize_rows_f32(g1.astype(jnp.float32))
    g2n = _normalize_rows_f32(g2.astype(jnp.float32))
    per_graph = jnp.sum(g2n * acc1 + g1n * acc2, axis=-1)
    return jnp.mean(per_graph)


@jax.jit
def _loss_with_batch(h1, h2, g1, g2, batch):
    num_graphs = g1.shape[0]
    acc1, acc2 = _run_accum(h1, h2, batch[None, :].astype(jnp.int32),
                            num_graphs, True)
    return _finalize(g1, g2, acc1, acc2)


@jax.jit
def _loss_no_batch(h1, h2, g1, g2):
    acc1, acc2 = _run_accum(h1, h2, None, 1, False)
    return _finalize(g1, g2, acc1, acc2)


def bootstrap_loss_g2l(h1_pred, h2_pred, g1_target, g2_target, batch=None):
    """JAX/Pallas equivalent of BootstrapLossG2L.forward."""
    h1 = jnp.asarray(h1_pred)
    h2 = jnp.asarray(h2_pred)
    g1 = jnp.asarray(g1_target, jnp.float32)
    g2 = jnp.asarray(g2_target, jnp.float32)
    if g1.ndim == 1:
        g1 = g1[None, :]
    if g2.ndim == 1:
        g2 = g2[None, :]
    if batch is None:
        return _loss_no_batch(h1, h2, g1, g2)
    return _loss_with_batch(h1, h2, g1, g2, jnp.asarray(batch, jnp.int32))


def _reference(h1, h2, g1, g2, pos_mask):
    def norm(x):
        n = jnp.sqrt(jnp.sum(x * x, axis=-1, keepdims=True))
        return x / jnp.maximum(n, _EPS)

    def term(g, h):
        return jnp.sum((norm(g) @ norm(h).T) * pos_mask, axis=-1)

    return jnp.mean(term(g2, h1) + term(g1, h2))


if __name__ == "__main__":
    key = jax.random.PRNGKey(0)
    k1, k2, k3, k4, k5, k6, k7, k8 = jax.random.split(key, 8)

    # --- small end-to-end check (2 graphs, 16 nodes, feature dim 32) --------
    G, N, D = 2, 16, 32
    h1_pred = jax.random.normal(k1, (N, D), jnp.float32)
    h2_pred = jax.random.normal(k2, (N, D), jnp.float32)
    g1_target = jax.random.normal(k3, (G, D), jnp.float32)
    g2_target = jax.random.normal(k4, (G, D), jnp.float32)
    batch = jnp.concatenate([jnp.zeros(8, jnp.int32), jnp.ones(8, jnp.int32)])

    loss = jax.block_until_ready(
        bootstrap_loss_g2l(h1_pred, h2_pred, g1_target, g2_target, batch))
    pos_mask = (batch[None, :] == jnp.arange(G)[:, None]).astype(jnp.float32)
    ref = _reference(h1_pred, h2_pred, g1_target, g2_target, pos_mask)
    # bf16 MXU operands (f32 accumulation) -> loosened tolerance vs f32 ref.
    assert jnp.abs(loss - ref) < 5e-2, (loss, ref)

    # batch=None path (single-graph globals); pure f32 path -> tight tolerance.
    loss_nb = jax.block_until_ready(
        bootstrap_loss_g2l(h1_pred, h2_pred, g1_target[0], g2_target[0],
                           batch=None))
    ref_nb = _reference(h1_pred, h2_pred, g1_target[0:1], g2_target[0:1],
                        jnp.ones((1, N), jnp.float32))
    assert jnp.abs(loss_nb - ref_nb) < 1e-3, (loss_nb, ref_nb)

    # --- multi-tile / dual-slice / ragged + phantom-tile path ---------------
    # Forced small tile so grid = (2, 3) with one phantom slot and a ragged
    # last real tile, independent of the per-generation tile sizing.
    N2, G2 = 1100, 3
    h1b = jax.random.normal(k5, (N2, D), jnp.float32)
    h2b = jax.random.normal(k6, (N2, D), jnp.float32)
    g1b = jax.random.normal(k7, (G2, D), jnp.float32)
    g2b = jax.random.normal(k8, (G2, D), jnp.float32)
    batch_b = jnp.sort(jax.random.randint(jax.random.PRNGKey(1), (N2,), 0, G2))
    acc1, acc2 = _run_accum(h1b, h2b, batch_b[None, :].astype(jnp.int32),
                            G2, True, tile_n=256)
    loss_mt = jax.block_until_ready(_finalize(g1b, g2b, acc1, acc2))
    pos_mask_b = (batch_b[None, :] == jnp.arange(G2)[:, None]).astype(
        jnp.float32)
    ref_mt = _reference(h1b, h2b, g1b, g2b, pos_mask_b)
    assert jnp.abs(loss_mt - ref_mt) < 1e-1, (loss_mt, ref_mt)

    print("KERNEL_OK")
</pallas_src>

<mosaic_0001>
module attributes {stable_mosaic.version = 11 : i64} {
  func.func @_g2l_accum_kernel(%arg0: i32, %arg1: i32, %arg2: memref<1x128xi32, #tpu.memory_space<vmem>>, %arg3: memref<128x32xf32, #tpu.memory_space<vmem>>, %arg4: memref<128x32xf32, #tpu.memory_space<vmem>>, %arg5: memref<1x2x32xf32, #tpu.memory_space<vmem>>, %arg6: memref<1x2x32xf32, #tpu.memory_space<vmem>>) attributes {dimension_semantics = [#tpu.dimension_semantics<parallel>, #tpu.dimension_semantics<arbitrary>], iteration_bounds = array<i64: 1, 1>, scalar_prefetch = 0 : i64, scratch_operands = 0 : i64, tpu.core_type = #tpu.core_type<tc>, window_params = [{transform_indices = @transform_0, window_bounds = array<i64: 1, 128>}, {transform_indices = @transform_1, window_bounds = array<i64: 128, 32>}, {transform_indices = @transform_2, window_bounds = array<i64: 128, 32>}, {transform_indices = @transform_3, window_bounds = array<i64: 1, 2, 32>}, {transform_indices = @transform_4, window_bounds = array<i64: 1, 2, 32>}]} {
    %c0_i32 = arith.constant 0 : i32
    %0 = arith.cmpi eq, %arg1, %c0_i32 : i32
    %1 = arith.extui %0 : i1 to i32
    %c0_i32_0 = arith.constant 0 : i32
    %2 = arith.cmpi ne, %1, %c0_i32_0 : i32
    scf.if %2 {
      %cst_28 = arith.constant 0.000000e+00 : f32
      %70 = vector.broadcast %cst_28 : f32 to vector<2x32xf32>
      %c0_29 = arith.constant 0 : index
      %c0_30 = arith.constant 0 : index
      %c0_31 = arith.constant 0 : index
      %71 = vector.load %arg5[%c0_29, %c0_30, %c0_31] : memref<1x2x32xf32, #tpu.memory_space<vmem>>, vector<1x2x32xf32>
      %72 = vector.shape_cast %71 : vector<1x2x32xf32> to vector<2x32xf32>
      %73 = vector.shape_cast %70 : vector<2x32xf32> to vector<1x2x32xf32>
      tpu.vector_store %arg5[%c0_29, %c0_30, %c0_31], %73 {strides = array<i32>} : memref<1x2x32xf32, #tpu.memory_space<vmem>>, vector<1x2x32xf32>,
      %cst_32 = arith.constant 0.000000e+00 : f32
      %74 = vector.broadcast %cst_32 : f32 to vector<2x32xf32>
      %c0_33 = arith.constant 0 : index
      %c0_34 = arith.constant 0 : index
      %c0_35 = arith.constant 0 : index
      %75 = vector.load %arg6[%c0_33, %c0_34, %c0_35] : memref<1x2x32xf32, #tpu.memory_space<vmem>>, vector<1x2x32xf32>
      %76 = vector.shape_cast %75 : vector<1x2x32xf32> to vector<2x32xf32>
      %77 = vector.shape_cast %74 : vector<2x32xf32> to vector<1x2x32xf32>
      tpu.vector_store %arg6[%c0_33, %c0_34, %c0_35], %77 {strides = array<i32>} : memref<1x2x32xf32, #tpu.memory_space<vmem>>, vector<1x2x32xf32>,
    } else {
    }
    %c0 = arith.constant 0 : index
    %c0_1 = arith.constant 0 : index
    %3 = vector.load %arg3[%c0, %c0_1] : memref<128x32xf32, #tpu.memory_space<vmem>>, vector<128x32xf32>
    %c0_2 = arith.constant 0 : index
    %c0_3 = arith.constant 0 : index
    %4 = vector.load %arg4[%c0_2, %c0_3] : memref<128x32xf32, #tpu.memory_space<vmem>>, vector<128x32xf32>
    %c1_i32 = arith.constant 1 : i32
    %5 = arith.muli %arg0, %c1_i32 : i32
    %6 = arith.addi %5, %arg1 : i32
    %c128_i32 = arith.constant 128 : i32
    %7 = arith.muli %6, %c128_i32 : i32
    %8 = tpu.iota {dimensions = array<i32: 0>} : vector<128x1xi32>
    %9 = vector.broadcast %7 : i32 to vector<128x1xi32>
    %10 = arith.addi %8, %9 : vector<128x1xi32>
    %c16_i32 = arith.constant 16 : i32
    %11 = vector.broadcast %c16_i32 : i32 to vector<128x1xi32>
    %12 = arith.cmpi slt, %10, %11 : vector<128x1xi32>
    %cst = arith.constant 0.000000e+00 : f32
    %13 = vector.shape_cast %12 : vector<128x1xi1> to vector<128x1xi1>
    %14 = vector.broadcast %13 : vector<128x1xi1> to vector<128x32xi1>
    %15 = vector.broadcast %cst : f32 to vector<128x32xf32>
    %16 = arith.select %14, %3, %15 : vector<128x32xi1>, vector<128x32xf32>
    %cst_4 = arith.constant 0.000000e+00 : f32
    %17 = vector.shape_cast %12 : vector<128x1xi1> to vector<128x1xi1>
    %18 = vector.broadcast %17 : vector<128x1xi1> to vector<128x32xi1>
    %19 = vector.broadcast %cst_4 : f32 to vector<128x32xf32>
    %20 = arith.select %18, %4, %19 : vector<128x32xi1>, vector<128x32xf32>
    %21 = arith.mulf %16, %16 : vector<128x32xf32>
    %cst_5 = arith.constant dense<0.000000e+00> : vector<128xf32>
    %22 = vector.multi_reduction <add>, %21, %cst_5 [1] : vector<128x32xf32> to vector<128xf32>
    %23 = vector.shape_cast %22 : vector<128xf32> to vector<128x1xf32>
    %cst_6 = arith.constant 1.000000e-24 : f32
    %24 = vector.broadcast %cst_6 : f32 to vector<128x1xf32>
    %25 = arith.maximumf %23, %24 : vector<128x1xf32>
    %26 = math.rsqrt %25 : vector<128x1xf32>
    %27 = arith.mulf %20, %20 : vector<128x32xf32>
    %cst_7 = arith.constant dense<0.000000e+00> : vector<128xf32>
    %28 = vector.multi_reduction <add>, %27, %cst_7 [1] : vector<128x32xf32> to vector<128xf32>
    %29 = vector.shape_cast %28 : vector<128xf32> to vector<128x1xf32>
    %cst_8 = arith.constant 1.000000e-24 : f32
    %30 = vector.broadcast %cst_8 : f32 to vector<128x1xf32>
    %31 = arith.maximumf %29, %30 : vector<128x1xf32>
    %32 = math.rsqrt %31 : vector<128x1xf32>
    %33 = tpu.iota {dimensions = array<i32: 0>} : vector<2x128xi32>
    %c0_9 = arith.constant 0 : index
    %c0_10 = arith.constant 0 : index
    %34 = vector.load %arg2[%c0_9, %c0_10] : memref<1x128xi32, #tpu.memory_space<vmem>>, vector<1x128xi32>
    %35 = vector.broadcast %34 : vector<1x128xi32> to vector<2x128xi32>
    %36 = arith.cmpi eq, %35, %33 : vector<2x128xi32>
    %c1_i32_11 = arith.constant 1 : i32
    %37 = arith.muli %arg0, %c1_i32_11 : i32
    %38 = arith.addi %37, %arg1 : i32
    %c128_i32_12 = arith.constant 128 : i32
    %39 = arith.muli %38, %c128_i32_12 : i32
    %40 = tpu.iota {dimensions = array<i32: 1>} : vector<1x128xi32>
    %41 = vector.broadcast %39 : i32 to vector<1x128xi32>
    %42 = arith.addi %40, %41 : vector<1x128xi32>
    %c16_i32_13 = arith.constant 16 : i32
    %43 = vector.broadcast %c16_i32_13 : i32 to vector<1x128xi32>
    %44 = arith.cmpi slt, %42, %43 : vector<1x128xi32>
    %45 = vector.broadcast %44 : vector<1x128xi1> to vector<2x128xi1>
    %46 = arith.andi %36, %45 : vector<2x128xi1>
    %47 = arith.extui %46 : vector<2x128xi1> to vector<2x128xi32>
    %48 = arith.sitofp %47 : vector<2x128xi32> to vector<2x128xf32>
    %49 = arith.truncf %48 : vector<2x128xf32> to vector<2x128xbf16>
    %50 = vector.broadcast %26 : vector<128x1xf32> to vector<128x32xf32>
    %51 = arith.mulf %16, %50 : vector<128x32xf32>
    %52 = arith.truncf %51 : vector<128x32xf32> to vector<128x32xbf16>
    %53 = vector.broadcast %32 : vector<128x1xf32> to vector<128x32xf32>
    %54 = arith.mulf %20, %53 : vector<128x32xf32>
    %55 = arith.truncf %54 : vector<128x32xf32> to vector<128x32xbf16>
    %c0_14 = arith.constant 0 : index
    %c0_15 = arith.constant 0 : index
    %c0_16 = arith.constant 0 : index
    %56 = vector.load %arg5[%c0_14, %c0_15, %c0_16] : memref<1x2x32xf32, #tpu.memory_space<vmem>>, vector<1x2x32xf32>
    %57 = vector.shape_cast %56 : vector<1x2x32xf32> to vector<2x32xf32>
    %cst_17 = arith.constant dense<0.000000e+00> : vector<2x32xf32>
    %58 = tpu.matmul %49, %52, %cst_17 {dimension_numbers = #tpu.dot_dimension_numbers<[1], [0], [0], [1], [0, 0, 1, 1], [], []>} : vector<2x128xbf16>, vector<128x32xbf16>, vector<2x32xf32> -> vector<2x32xf32>
    %59 = arith.addf %57, %58 : vector<2x32xf32>
    %c0_18 = arith.constant 0 : index
    %c0_19 = arith.constant 0 : index
    %c0_20 = arith.constant 0 : index
    %60 = vector.load %arg5[%c0_18, %c0_19, %c0_20] : memref<1x2x32xf32, #tpu.memory_space<vmem>>, vector<1x2x32xf32>
    %61 = vector.shape_cast %60 : vector<1x2x32xf32> to vector<2x32xf32>
    %62 = vector.shape_cast %59 : vector<2x32xf32> to vector<1x2x32xf32>
    tpu.vector_store %arg5[%c0_18, %c0_19, %c0_20], %62 {strides = array<i32>} : memref<1x2x32xf32, #tpu.memory_space<vmem>>, vector<1x2x32xf32>,
    %c0_21 = arith.constant 0 : index
    %c0_22 = arith.constant 0 : index
    %c0_23 = arith.constant 0 : index
    %63 = vector.load %arg6[%c0_21, %c0_22, %c0_23] : memref<1x2x32xf32, #tpu.memory_space<vmem>>, vector<1x2x32xf32>
    %64 = vector.shape_cast %63 : vector<1x2x32xf32> to vector<2x32xf32>
    %cst_24 = arith.constant dense<0.000000e+00> : vector<2x32xf32>
    %65 = tpu.matmul %49, %55, %cst_24 {dimension_numbers = #tpu.dot_dimension_numbers<[1], [0], [0], [1], [0, 0, 1, 1], [], []>} : vector<2x128xbf16>, vector<128x32xbf16>, vector<2x32xf32> -> vector<2x32xf32>
    %66 = arith.addf %64, %65 : vector<2x32xf32>
    %c0_25 = arith.constant 0 : index
    %c0_26 = arith.constant 0 : index
    %c0_27 = arith.constant 0 : index
    %67 = vector.load %arg6[%c0_25, %c0_26, %c0_27] : memref<1x2x32xf32, #tpu.memory_space<vmem>>, vector<1x2x32xf32>
    %68 = vector.shape_cast %67 : vector<1x2x32xf32> to vector<2x32xf32>
    %69 = vector.shape_cast %66 : vector<2x32xf32> to vector<1x2x32xf32>
    tpu.vector_store %arg6[%c0_25, %c0_26, %c0_27], %69 {strides = array<i32>} : memref<1x2x32xf32, #tpu.memory_space<vmem>>, vector<1x2x32xf32>,
    return
  }
  func.func @transform_0(%arg0: i32, %arg1: i32) -> (i32, i32) {
    %c1_i32 = arith.constant 1 : i32
    %0 = arith.muli %arg0, %c1_i32 : i32
    %1 = arith.addi %0, %arg1 : i32
    %c0_i32 = arith.constant 0 : i32
    %2 = arith.minsi %1, %c0_i32 : i32
    %c0_i32_0 = arith.constant 0 : i32
    %c0_i32_1 = arith.constant 0 : i32
    return %c0_i32_0, %2 : i32, i32
  }
  func.func @transform_1(%arg0: i32, %arg1: i32) -> (i32, i32) {
    %c1_i32 = arith.constant 1 : i32
    %0 = arith.muli %arg0, %c1_i32 : i32
    %1 = arith.addi %0, %arg1 : i32
    %c0_i32 = arith.constant 0 : i32
    %2 = arith.minsi %1, %c0_i32 : i32
    %c0_i32_0 = arith.constant 0 : i32
    %c0_i32_1 = arith.constant 0 : i32
    return %2, %c0_i32_0 : i32, i32
  }
  func.func @transform_2(%arg0: i32, %arg1: i32) -> (i32, i32) {
    %c1_i32 = arith.constant 1 : i32
    %0 = arith.muli %arg0, %c1_i32 : i32
    %1 = arith.addi %0, %arg1 : i32
    %c0_i32 = arith.constant 0 : i32
    %2 = arith.minsi %1, %c0_i32 : i32
    %c0_i32_0 = arith.constant 0 : i32
    %c0_i32_1 = arith.constant 0 : i32
    return %2, %c0_i32_0 : i32, i32
  }
  func.func @transform_3(%arg0: i32, %arg1: i32) -> (i32, i32, i32) {
    %c0_i32 = arith.constant 0 : i32
    %c0_i32_0 = arith.constant 0 : i32
    %c0_i32_1 = arith.constant 0 : i32
    return %arg0, %c0_i32, %c0_i32_0 : i32, i32, i32
  }
  func.func @transform_4(%arg0: i32, %arg1: i32) -> (i32, i32, i32) {
    %c0_i32 = arith.constant 0 : i32
    %c0_i32_0 = arith.constant 0 : i32
    %c0_i32_1 = arith.constant 0 : i32
    return %arg0, %c0_i32, %c0_i32_0 : i32, i32, i32
  }
}

</mosaic_0001>

<bundles_post_ra>
// kernel: _loss_with_batch.1
= control target key start
LH: loop header
LB: loop body
LE: loop exit
PB: predicated region body
PF: predicated region fallthrough
CT: control target
= control target key end

     0   :  { %10 = vsyncpa [#allocation3], 0  ;;  %s941_s0 = inlined_call_operand.hbm [shape: s32[1,16], index: 0, kind: input, shape index: {}]   ;;  %s942_s1 = inlined_call_operand.hbm [shape: f32[16,32], index: 1, kind: input, shape index: {}]   ;;  %s943_s2 = inlined_call_operand.vmem [shape: f32[16,32], index: 2, kind: input, shape index: {}]   ;;  %s944_s3 = inlined_call_operand.vmem [shape: f32[1,2,32], index: 3, kind: output, shape index: {0}]   ;;  %s945_s4 = inlined_call_operand.vmem [shape: f32[1,2,32], index: 4, kind: output, shape index: {1}]  }
   0x1   :  { %11 = vsyncpa [#allocation5], 0  ;;  %s807_s15 = smov [#allocation2]  }
   0x2   :  { %s23_s16 = sshll.u32 %s807_s15, 4  ;;  %s24_s16 = int_to_ptr.vmem [resolvable:$true] %s23_s16 }
   0x3   :  { %s771_s17 = scalar_lea.vmem %s24_s16, 16  ;;  %s775_s18 = scalar_lea.vmem %s24_s16, 32 }
   0x4   :  { %p772_p0 = scmp.ne.s32.totalorder %s24_s16, %s771_s17  ;;  %p776_p1 = scmp.lt.s32.totalorder %s24_s16, %s24_s16 }
   0x5   :  { %p777_p2 = scmp.lt.s32.totalorder %s775_s18, %s771_s17 }
   0x7   :  { %p778_p3 = por %p777_p2, %p776_p1 }
   0x9   :  { %p779_p4 = pnand %p778_p3, %p772_p0 }
   0xb   :  { %782 = shalt.err (!%p779_p4)
}
   0xc   :  { %26 = dma.hbm_to_vmem [thread:$0]  %s941_s0, 16, %s24_s16, [#allocation3]  }
   0xd   :  { %37 = vsyncadd [#allocation5], 1792  ;;  %s808_s21 = smov [#allocation4]  }
   0xe   :  { %s42_s22 = sshll.u32 %s808_s21, 4  ;;  %s43_s22 = int_to_ptr.vmem [resolvable:$true] %s42_s22 }
   0xf   :  { %s791_s23 = scalar_lea.vmem %s43_s22, 256  ;;  %s795_s24 = scalar_lea.vmem %s43_s22, 2048 }
  0x10   :  { %p792_p5 = scmp.ne.s32.totalorder %s43_s22, %s791_s23  ;;  %p796_p6 = scmp.lt.s32.totalorder %s43_s22, %s43_s22 }
  0x11   :  { %p797_p7 = scmp.lt.s32.totalorder %s795_s24, %s791_s23 }
  0x13   :  { %p798_p8 = por %p797_p7, %p796_p6 }
  0x15   :  { %p799_p9 = pnand %p798_p8, %p792_p5 }
  0x17   :  { %802 = shalt.err (!%p799_p9)
}
  0x18   :  { %s809_s25 = smov 128   ;;  %s810_s26 = smov 8  }
  0x19   :  { %48 = dma.hbm_to_vmem [thread:$0]  %s942_s1, 256, %s43_s22, [#allocation5], %s809_s25, %s809_s25, %s810_s26  }
  0x1a   :  { %803 = dma.done.wait [#allocation3], 16  }
  0x1b   :  { %804 = vsyncadd [#allocation3], 4294967280 }
  0x1c   :  { %805 = dma.done.wait [#allocation5], 2048  }
  0x1d   :  { %806 = vsyncadd [#allocation5], 4294965248  ;;  %v811_v0 = vmov 0.0   ;;  %v871_v1 = vld [vmem:[#allocation4 + $0x8] sm:$0xff]  ;;  %v873_v2 = vld [vmem:[#allocation4] sm:$0xff]  ;;  %vm280_vm0 = vcmask 261120  }
  0x1e   :  { %420 = vadd.xlane.f32.xlu1 %v811_v0  ;;  %324 = vadd.xlane.f32.xlu0 %v811_v0  ;;  %v265_v3 = vmul.f32 %v871_v1, %v871_v1  ;;  %v264_v4 = vmul.f32 %v873_v2, %v873_v2  ;;  %v884_v5 = vld [vmem:[%s943_s2 + $0x8] sm:$0xff]  ;;  %v889_v6 = vld [vmem:[%s943_s2] sm:$0xff]  ;;  %vm812_vm1 = vmmov 0   ;;  %vm113_vm2 = vcmask 254976  }
  0x1f   :  { %652 = vmatprep.subr.bf16.mxu0 %v811_v0  ;;  %672 = vmatprep.subr.bf16.mxu1 %v811_v0  ;;  %v362_v9 = vmul.f32 %v884_v5, %v884_v5  ;;  %v361_v10 = vmul.f32 %v889_v6, %v889_v6  ;;  %114 = vst.msk [vmem:[%s944_s3] sm:$0x3] %vm113_vm2, %v811_v0  ;;  %115 = vst.msk [vmem:[%s945_s4] sm:$0x3] %vm113_vm2, %v811_v0 }
  0x20   :  { %v284_v7 = vsel %vm280_vm0, %v265_v3, 0.0  ;;  %v281_v8 = vsel %vm280_vm0, %v264_v4, 0.0  ;;  %668 = vmatprep.mubr.msk.bf16.mxu0 %vm812_vm1, %v811_v0  ;;  %688 = vmatprep.mubr.msk.bf16.mxu1 %vm812_vm1, %v811_v0 }
  0x21   :  { %v380_v11 = vsel %vm280_vm0, %v362_v9, 0.0  ;;  %v377_v12 = vsel %vm280_vm0, %v361_v10, 0.0 }
  0x22   :  { %423 = vadd.xlane.f32.xlu1 %v811_v0  ;;  %327 = vadd.xlane.f32.xlu0 %v811_v0 }
  0x26   :  { %321 = vadd.xlane.f32.xlu1 %v811_v0  ;;  %318 = vadd.xlane.f32.xlu0 %v811_v0 }
  0x2a   :  { %417 = vadd.xlane.f32.xlu1 %v811_v0  ;;  %414 = vadd.xlane.f32.xlu0 %v811_v0 }
  0x2e   :  { %315 = vadd.xlane.f32.xlu1 %v811_v0  ;;  %312 = vadd.xlane.f32.xlu0 %v811_v0 }
  0x32   :  { %411 = vadd.xlane.f32.xlu1 %v811_v0  ;;  %408 = vadd.xlane.f32.xlu0 %v811_v0 }
  0x36   :  { %309 = vadd.xlane.f32.xlu1 %v811_v0  ;;  %306 = vadd.xlane.f32.xlu0 %v811_v0 }
  0x3a   :  { %405 = vadd.xlane.f32.xlu1 %v811_v0  ;;  %402 = vadd.xlane.f32.xlu0 %v811_v0 }
  0x3e   :  { %303 = vadd.xlane.f32.xlu1 %v811_v0  ;;  %300 = vadd.xlane.f32.xlu0 %v811_v0 }
  0x42   :  { %399 = vadd.xlane.f32.xlu1 %v811_v0  ;;  %396 = vadd.xlane.f32.xlu0 %v811_v0 }
  0x46   :  { %297 = vadd.xlane.f32.xlu1 %v811_v0  ;;  %294 = vadd.xlane.f32.xlu0 %v811_v0 }
  0x4a   :  { %393 = vadd.xlane.f32.xlu1 %v811_v0  ;;  %390 = vadd.xlane.f32.xlu0 %v811_v0 }
  0x4e   :  { %291 = vadd.xlane.f32.xlu1 %v811_v0  ;;  %288 = vadd.xlane.f32.xlu0 %v811_v0 }
  0x52   :  { %387 = vadd.xlane.f32.xlu1 %v811_v0  ;;  %384 = vadd.xlane.f32.xlu0 %v811_v0 }
  0x56   :  { %285 = vadd.xlane.f32.xlu1 %v284_v7  ;;  %282 = vadd.xlane.f32.xlu0 %v281_v8 }
  0x5a   :  { %381 = vadd.xlane.f32.xlu1 %v380_v11  ;;  %378 = vadd.xlane.f32.xlu0 %v377_v12 }
  0xa7   :  { %v421_v13 = vpop.xlane.xlu1 %420  ;;  %v325_v14 = vpop.xlane.xlu0 %324 }
  0xa8   :  { %v439_v15 = vmax.f32 %v421_v13, 1e-24  ;;  %v343_v16 = vmax.f32 %v325_v14, 1e-24 }
  0xaa   :  { %699 = vrsqrt.f32 %v439_v15 }
  0xab   :  { %v424_v17 = vpop.xlane.xlu1 %423  ;;  %v328_v18 = vpop.xlane.xlu0 %327  ;;  %701 = vrsqrt.f32 %v343_v16 }
  0xac   :  { %v440_v19 = vmax.f32 %v424_v17, 1e-24  ;;  %v344_v20 = vmax.f32 %v328_v18, 1e-24 }
  0xae   :  { %703 = vrsqrt.f32 %v440_v19 }
  0xaf   :  { %705 = vrsqrt.f32 %v344_v20  ;;  %v322_v21 = vpop.xlane.xlu1 %321  ;;  %v319_v22 = vpop.xlane.xlu0 %318 }
  0xb0   :  { %v342_v23 = vmax.f32 %v322_v21, 1e-24  ;;  %v341_v24 = vmax.f32 %v319_v22, 1e-24 }
  0xb2   :  { %707 = vrsqrt.f32 %v342_v23 }
  0xb3   :  { %709 = vrsqrt.f32 %v341_v24  ;;  %v418_v25 = vpop.xlane.xlu1 %417  ;;  %v415_v26 = vpop.xlane.xlu0 %414 }
  0xb4   :  { %v438_v27 = vmax.f32 %v418_v25, 1e-24  ;;  %v437_v28 = vmax.f32 %v415_v26, 1e-24 }
  0xb6   :  { %711 = vrsqrt.f32 %v438_v27 }
  0xb7   :  { %713 = vrsqrt.f32 %v437_v28  ;;  %v316_v29 = vpop.xlane.xlu1 %315  ;;  %v313_v30 = vpop.xlane.xlu0 %312 }
  0xb8   :  { %v340_v31 = vmax.f32 %v316_v29, 1e-24  ;;  %v339_v32 = vmax.f32 %v313_v30, 1e-24  ;;  %v700_v33 = vpop.eup %699 }
  0xb9   :  { %v702_v34 = vpop.eup %701  ;;  %v511_v41 = vmul.f32 0.0, %v700_v33 }
  0xba   :  { %715 = vrsqrt.f32 %v340_v31  ;;  %v487_v43 = vmul.f32 0.0, %v702_v34 }
  0xbb   :  { %v704_v35 = vpop.eup %703  ;;  %717 = vrsqrt.f32 %v339_v32  ;;  %v412_v36 = vpop.xlane.xlu1 %411 }
  0xbc   :  { %v409_v37 = vpop.xlane.xlu0 %408  ;;  %v706_v38 = vpop.eup %705  ;;  %v436_v39 = vmax.f32 %v412_v36, 1e-24  ;;  %v512_v42 = vmul.f32 0.0, %v704_v35 }
  0xbd   :  { %v435_v40 = vmax.f32 %v409_v37, 1e-24  ;;  %v488_v44 = vmul.f32 0.0, %v706_v38 }
  0xbe   :  { %719 = vrsqrt.f32 %v436_v39  ;;  %v520_v45 = vpack.c.bf16 %v512_v42, %v511_v41 }
  0xbf   :  { %v708_v46 = vpop.eup %707  ;;  %721 = vrsqrt.f32 %v435_v40  ;;  %v310_v47 = vpop.xlane.xlu1 %309  ;;  %v496_v49 = vpack.c.bf16 %v488_v44, %v487_v43 }
  0xc0   :  { %v307_v48 = vpop.xlane.xlu0 %306  ;;  %v710_v50 = vpop.eup %709  ;;  %v486_v51 = vmul.f32 0.0, %v708_v46  ;;  %v338_v52 = vmax.f32 %v310_v47, 1e-24  ;;  %673 = vmatpush3.bf16.msra.mxu1 %v520_v45 }
  0xc1   :  { %v337_v53 = vmax.f32 %v307_v48, 1e-24  ;;  %v485_v54 = vmul.f32 0.0, %v710_v50  ;;  %653 = vmatpush3.bf16.msra.mxu0 %v496_v49  ;;  %674 = vmatprep.subr.bf16.mxu1 %v811_v0 }
  0xc2   :  { %723 = vrsqrt.f32 %v338_v52  ;;  %654 = vmatprep.subr.bf16.mxu0 %v811_v0 }
  0xc3   :  { %v712_v55 = vpop.eup %711  ;;  %725 = vrsqrt.f32 %v337_v53  ;;  %v406_v56 = vpop.xlane.xlu1 %405  ;;  %v495_v58 = vpack.c.bf16 %v486_v51, %v485_v54 }
  0xc4   :  { %v403_v57 = vpop.xlane.xlu0 %402  ;;  %v714_v59 = vpop.eup %713  ;;  %v510_v60 = vmul.f32 0.0, %v712_v55  ;;  %v434_v61 = vmax.f32 %v406_v56, 1e-24 }
  0xc5   :  { %v433_v62 = vmax.f32 %v403_v57, 1e-24  ;;  %v509_v63 = vmul.f32 0.0, %v714_v59  ;;  %655 = vmatpush3.bf16.msra.mxu0 %v495_v58 }
  0xc6   :  { %727 = vrsqrt.f32 %v434_v61  ;;  %656 = vmatprep.subr.bf16.mxu0 %v811_v0 }
  0xc7   :  { %v716_v3 = vpop.eup %715  ;;  %729 = vrsqrt.f32 %v433_v62  ;;  %v304_v4 = vpop.xlane.xlu1 %303  ;;  %v519_v8 = vpack.c.bf16 %v510_v60, %v509_v63 }
  0xc8   :  { %v301_v7 = vpop.xlane.xlu0 %300  ;;  %v718_v9 = vpop.eup %717  ;;  %v484_v10 = vmul.f32 0.0, %v716_v3  ;;  %v336_v11 = vmax.f32 %v304_v4, 1e-24 }
  0xc9   :  { %v335_v12 = vmax.f32 %v301_v7, 1e-24  ;;  %v483_v13 = vmul.f32 0.0, %v718_v9  ;;  %675 = vmatpush3.bf16.msra.mxu1 %v519_v8 }
  0xca   :  { %731 = vrsqrt.f32 %v336_v11  ;;  %676 = vmatprep.subr.bf16.mxu1 %v811_v0 }
  0xcb   :  { %v720_v14 = vpop.eup %719  ;;  %733 = vrsqrt.f32 %v335_v12  ;;  %v400_v15 = vpop.xlane.xlu1 %399  ;;  %v494_v17 = vpack.c.bf16 %v484_v10, %v483_v13 }
  0xcc   :  { %v397_v16 = vpop.xlane.xlu0 %396  ;;  %v722_v18 = vpop.eup %721  ;;  %v508_v19 = vmul.f32 0.0, %v720_v14  ;;  %v432_v20 = vmax.f32 %v400_v15, 1e-24 }
  0xcd   :  { %v431_v21 = vmax.f32 %v397_v16, 1e-24  ;;  %v507_v22 = vmul.f32 0.0, %v722_v18  ;;  %657 = vmatpush3.bf16.msra.mxu0 %v494_v17 }
  0xce   :  { %735 = vrsqrt.f32 %v432_v20  ;;  %658 = vmatprep.subr.bf16.mxu0 %v811_v0  ;;  %v150_v20 = vlaneseq }
  0xcf   :  { %v724_v23 = vpop.eup %723  ;;  %737 = vrsqrt.f32 %v431_v21  ;;  %v298_v24 = vpop.xlane.xlu1 %297  ;;  %v518_v26 = vpack.c.bf16 %v508_v19, %v507_v22 }
  0xd0   :  { %v295_v25 = vpop.xlane.xlu0 %294  ;;  %v726_v27 = vpop.eup %725  ;;  %v482_v28 = vmul.f32 0.0, %v724_v23  ;;  %v334_v29 = vmax.f32 %v298_v24, 1e-24 }
  0xd1   :  { %v333_v30 = vmax.f32 %v295_v25, 1e-24  ;;  %v481_v31 = vmul.f32 0.0, %v726_v27  ;;  %677 = vmatpush3.bf16.msra.mxu1 %v518_v26  ;;  %v151_v26 = vshrl.u32 %v150_v20, 7  ;;  %v464_v27 = vand.u32 127, %v150_v20 }
  0xd2   :  { %739 = vrsqrt.f32 %v334_v29  ;;  %678 = vmatprep.subr.bf16.mxu1 %v811_v0 }
  0xd3   :  { %v728_v32 = vpop.eup %727  ;;  %741 = vrsqrt.f32 %v333_v30  ;;  %v394_v33 = vpop.xlane.xlu1 %393  ;;  %v493_v35 = vpack.c.bf16 %v482_v28, %v481_v31  ;;  %v628_v30 = vld [vmem:[#allocation2] ss:$0 sm:$0xff]  ;;  %vm466_vm4 = vcmp.lt.s32.totalorder %v464_v27, 16 }
  0xd4   :  { %v391_v34 = vpop.xlane.xlu0 %390  ;;  %v730_v36 = vpop.eup %729  ;;  %v506_v37 = vmul.f32 0.0, %v728_v32  ;;  %v430_v38 = vmax.f32 %v394_v33, 1e-24  ;;  %vm462_vm3 = vcmp.eq.s32.totalorder %v628_v30, %v151_v26 }
  0xd5   :  { %v429_v39 = vmax.f32 %v391_v34, 1e-24  ;;  %v505_v40 = vmul.f32 0.0, %v730_v36  ;;  %659 = vmatpush3.bf16.msra.mxu0 %v493_v35  ;;  %vm469_vm5 = vmand %vm462_vm3, %vm466_vm4 }
  0xd6   :  { %743 = vrsqrt.f32 %v430_v38  ;;  %660 = vmatprep.subr.bf16.mxu0 %v811_v0  ;;  %vm630_vm6 = vmpackc.low %vm469_vm5, %vm469_vm5 }
  0xd7   :  { %v732_v41 = vpop.eup %731  ;;  %745 = vrsqrt.f32 %v429_v39  ;;  %v292_v42 = vpop.xlane.xlu1 %291  ;;  %v517_v44 = vpack.c.bf16 %v506_v37, %v505_v40 }
  0xd8   :  { %v289_v43 = vpop.xlane.xlu0 %288  ;;  %v734_v45 = vpop.eup %733  ;;  %v480_v46 = vmul.f32 0.0, %v732_v41  ;;  %v332_v47 = vmax.f32 %v292_v42, 1e-24 }
  0xd9   :  { %v331_v48 = vmax.f32 %v289_v43, 1e-24  ;;  %v479_v49 = vmul.f32 0.0, %v734_v45  ;;  %679 = vmatpush3.bf16.msra.mxu1 %v517_v44  ;;  %v813_v43 = vmov 1.0|1.0  }
  0xda   :  { %747 = vrsqrt.f32 %v332_v47  ;;  %680 = vmatprep.subr.bf16.mxu1 %v811_v0 }
  0xdb   :  { %v736_v50 = vpop.eup %735  ;;  %749 = vrsqrt.f32 %v331_v48  ;;  %v388_v51 = vpop.xlane.xlu1 %387  ;;  %v492_v53 = vpack.c.bf16 %v480_v46, %v479_v49 }
  0xdc   :  { %v385_v52 = vpop.xlane.xlu0 %384  ;;  %v738_v54 = vpop.eup %737  ;;  %v504_v55 = vmul.f32 0.0, %v736_v50  ;;  %v428_v56 = vmax.f32 %v388_v51, 1e-24 }
  0xdd   :  { %v427_v57 = vmax.f32 %v385_v52, 1e-24  ;;  %v503_v58 = vmul.f32 0.0, %v738_v54  ;;  %661 = vmatpush3.bf16.msra.mxu0 %v492_v53 }
  0xde   :  { %751 = vrsqrt.f32 %v428_v56  ;;  %662 = vmatprep.subr.bf16.mxu0 %v811_v0 }
  0xdf   :  { %v740_v59 = vpop.eup %739  ;;  %753 = vrsqrt.f32 %v427_v57  ;;  %v286_v60 = vpop.xlane.xlu1 %285  ;;  %v516_v62 = vpack.c.bf16 %v504_v55, %v503_v58 }
  0xe0   :  { %v283_v61 = vpop.xlane.xlu0 %282  ;;  %v742_v63 = vpop.eup %741  ;;  %v478_v3 = vmul.f32 0.0, %v740_v59  ;;  %v330_v4 = vmax.f32 %v286_v60, 1e-24 }
  0xe1   :  { %v329_v7 = vmax.f32 %v283_v61, 1e-24  ;;  %v477_v8 = vmul.f32 0.0, %v742_v63  ;;  %681 = vmatpush3.bf16.msra.mxu1 %v516_v62 }
  0xe2   :  { %755 = vrsqrt.f32 %v330_v4  ;;  %682 = vmatprep.subr.bf16.mxu1 %v811_v0 }
  0xe3   :  { %v744_v9 = vpop.eup %743  ;;  %757 = vrsqrt.f32 %v329_v7  ;;  %v382_v10 = vpop.xlane.xlu1 %381  ;;  %v491_v12 = vpack.c.bf16 %v478_v3, %v477_v8 }
  0xe4   :  { %v379_v11 = vpop.xlane.xlu0 %378  ;;  %v746_v13 = vpop.eup %745  ;;  %v502_v14 = vmul.f32 0.0, %v744_v9  ;;  %v426_v15 = vmax.f32 %v382_v10, 1e-24 }
  0xe5   :  { %v425_v16 = vmax.f32 %v379_v11, 1e-24  ;;  %v501_v17 = vmul.f32 0.0, %v746_v13  ;;  %663 = vmatpush3.bf16.msra.mxu0 %v491_v12 }
  0xe6   :  { %759 = vrsqrt.f32 %v426_v15  ;;  %664 = vmatprep.subr.bf16.mxu0 %v811_v0 }
  0xe7   :  { %v748_v18 = vpop.eup %747  ;;  %761 = vrsqrt.f32 %v425_v16  ;;  %v515_v19 = vpack.c.bf16 %v502_v14, %v501_v17 }
  0xe8   :  { %v750_v21 = vpop.eup %749  ;;  %v476_v22 = vmul.f32 0.0, %v748_v18 }
  0xe9   :  { %v475_v23 = vmul.f32 0.0, %v750_v21  ;;  %683 = vmatpush3.bf16.msra.mxu1 %v515_v19 }
  0xea   :  { %684 = vmatprep.subr.bf16.mxu1 %v811_v0 }
  0xeb   :  { %v752_v24 = vpop.eup %751  ;;  %v490_v25 = vpack.c.bf16 %v476_v22, %v475_v23 }
  0xec   :  { %v754_v28 = vpop.eup %753  ;;  %v500_v29 = vmul.f32 0.0, %v752_v24 }
  0xed   :  { %v499_v31 = vmul.f32 0.0, %v754_v28  ;;  %665 = vmatpush3.bf16.msra.mxu0 %v490_v25 }
  0xee   :  { %666 = vmatprep.subr.bf16.mxu0 %v811_v0 }
  0xef   :  { %v756_v32 = vpop.eup %755  ;;  %v514_v33 = vpack.c.bf16 %v500_v29, %v499_v31 }
  0xf0   :  { %v758_v34 = vpop.eup %757  ;;  %v474_v35 = vmul.f32 %v756_v32, %v871_v1  ;;  %v521_v1 = vld [vmem:[%s944_s3] sm:$0x3] }
  0xf1   :  { %685 = vmatpush3.bf16.msra.mxu1 %v514_v33  ;;  %v473_v36 = vmul.f32 %v758_v34, %v873_v2 }
  0xf2   :  { %686 = vmatprep.subr.bf16.mxu1 %v811_v0 }
  0xf3   :  { %v760_v37 = vpop.eup %759  ;;  %v489_v38 = vpack.c.bf16 %v474_v35, %v473_v36 }
  0xf4   :  { %v762_v39 = vpop.eup %761  ;;  %v498_v40 = vmul.f32 %v760_v37, %v884_v5  ;;  %v565_v5 = vld [vmem:[%s945_s4] sm:$0x3] }
  0xf5   :  { %667 = vmatpush3.bf16.msra.mxu0 %v489_v38  ;;  %v497_v41 = vmul.f32 %v762_v39, %v889_v6 }
  0xf7   :  { %v513_v42 = vpack.c.bf16 %v498_v40, %v497_v41 }
  0xf8   :  { %669 = vmatmul.mubr.msk.bf16.vlgmr.msra.gmra.mxu0 %vm630_vm6, %v813_v43 }
  0xf9   :  { %687 = vmatpush3.bf16.msra.mxu1 %v513_v42 }
  0xfc   :  { %689 = vmatmul.mubr.msk.bf16.vlgmr.msra.gmra.mxu1 %vm630_vm6, %v813_v43 }
 0x1b8   :  { %v556_v2 = vpop.f32.mrf.mxu0 }
 0x1b9   :  { %v562_v0 = vadd.f32 %v556_v2, %v521_v1 }
 0x1ba   :  { %v670_v44 = vpop.f32.mrf.mxu0 }
 0x1bb   :  { %564 = vst.msk [vmem:[%s944_s3] sm:$0x3] %vm113_vm2, %v562_v0 }
 0x1bc   :  { %v559_v6 = vpop.f32.mrf.mxu0  ;;  %v600_v45 = vpop.f32.mrf.mxu1 }
 0x1bd   :  { %v606_v46 = vadd.f32 %v600_v45, %v565_v5 }
 0x1be   :  { %v671_v47 = vpop.f32.mrf.mxu0  ;;  %v690_v48 = vpop.f32.mrf.mxu1 }
 0x1bf   :  { %607 = vst.msk [vmem:[%s945_s4] sm:$0x3] %vm113_vm2, %v606_v46 }
 0x1c0   :  { %v603_v49 = vpop.f32.mrf.mxu1 }
 0x1c2   :  { %v691_v50 = vpop.f32.mrf.mxu1 }
 0x1c3   :  { %616 = vsyncpa [#allocation3], 1 }
 0x1c4   :  { %617 = vsyncpa [#allocation5], 1 }

</bundles_post_ra>
